<compile_context>
chip_gen: v5e
topology: v5e:2x2
jax: 0.10.0
libtpu: 0.0.40
codegen_flags: <defaults>
</compile_context>

<pallas_src>
import math
import functools

import jax
import jax.numpy as jnp
from jax import lax
from jax.experimental import pallas as pl
from jax.experimental.pallas import tpu as pltpu

_UNROLL = 8  # tokens gathered per inner-loop iteration (must divide tile_tokens)


def _token_embedding_kernel(ids_ref, emb_ref, out_ref, *, tile_tokens, scale):
    # ids_ref : (n_pad,) int32 token ids in SMEM (scalar-prefetched; already
    #           clamped to [0, V-1] and tail-padded in the wrapper).
    # emb_ref : (V, E)  embedding table, VMEM-resident (constant block index).
    # out_ref : (tile_tokens, E) output tile.
    base = pl.program_id(0) * tile_tokens

    def gather_chunk(c, carry):
        # Manual 8-way unroll: a window of independent dynamic row loads and
        # row stores the scheduler can overlap; amortizes loop overhead.
        t0 = c * _UNROLL
        for u in range(_UNROLL):
            t = t0 + u
            tok = ids_ref[base + t]                  # cheap SMEM scalar read
            row = emb_ref[pl.ds(tok, 1), :]          # (1, E) dynamic row load
            out_ref[pl.ds(t, 1), :] = row * scale    # scale fused on store path
        return carry

    lax.fori_loop(0, tile_tokens // _UNROLL, gather_chunk, 0)


def token_embedding(tokens, emb_table, *, tile_tokens=256):
    """Equivalent of TokenEmbedding.forward: embedding(tokens.long()) * sqrt(E)."""
    vocab_size, emb_size = emb_table.shape
    orig_shape = tokens.shape
    scale = math.sqrt(emb_size)

    ids = tokens.reshape(-1).astype(jnp.int32)       # flat token axis
    n = ids.shape[0]

    # Tile size: multiple of _UNROLL (and of 8 f32 sublanes); large enough to
    # amortize the ~0.35 us per-grid-step overhead, but not over-padded for
    # tiny inputs.
    tile_tokens = max(_UNROLL,
                      min(pl.cdiv(int(tile_tokens), _UNROLL) * _UNROLL,
                          pl.cdiv(n, _UNROLL) * _UNROLL))
    num_tiles = pl.cdiv(n, tile_tokens)
    n_pad = num_tiles * tile_tokens

    # Clamp dirty ids (nn.Embedding would raise on them) and pad the tail so
    # every tile does identical full work; padded rows are sliced off below.
    ids = jnp.clip(ids, 0, vocab_size - 1)
    if n_pad != n:
        ids = jnp.pad(ids, (0, n_pad - n))

    # NOTE: for best store bandwidth emb_size should be a multiple of 128
    # (lane-dense output).  Smaller E (as in this toy test) still works but
    # lowers to masked partial stores.
    itemsize = jnp.dtype(emb_table.dtype).itemsize
    table_bytes = vocab_size * emb_size * itemsize
    out_tile_bytes = tile_tokens * emb_size * itemsize
    # table (x2 buffers) + output (x2 buffers) + headroom, clamped to a range
    # that is safe on v5e (16 MiB scoped default) through v7x (64 MiB VMEM).
    vmem_limit = int(min(64 * 1024 * 1024,
                         max(16 * 1024 * 1024,
                             2 * table_bytes + 4 * out_tile_bytes + (1 << 20))))

    out = pl.pallas_call(
        functools.partial(_token_embedding_kernel,
                          tile_tokens=tile_tokens,
                          scale=scale),
        out_shape=jax.ShapeDtypeStruct((n_pad, emb_size), emb_table.dtype),
        grid_spec=pltpu.PrefetchScalarGridSpec(
            num_scalar_prefetch=1,                    # ids -> SMEM
            grid=(num_tiles,),
            in_specs=[
                # Full table, constant block index -> fetched once, resident.
                # (For huge vocab, see TODO at top: keep it in HBM instead.)
                pl.BlockSpec((vocab_size, emb_size), lambda i, ids: (0, 0)),
            ],
            out_specs=pl.BlockSpec((tile_tokens, emb_size),
                                   lambda i, ids: (i, 0)),
        ),
        compiler_params=pltpu.CompilerParams(
            dimension_semantics=("parallel",),        # shard tokens on v7x
            vmem_limit_bytes=vmem_limit),
    )(ids, emb_table)

    return out[:n].reshape(*orig_shape, emb_size)


if __name__ == "__main__":
    vocab_size = 32
    emb_size = 32
    batch, seq = 2, 8

    key = jax.random.PRNGKey(0)
    k_emb, k_tok = jax.random.split(key)

    # Deterministic parameter init (synthetic; nn.Embedding default is N(0,1)).
    emb_table = jax.random.normal(k_emb, (vocab_size, emb_size), jnp.float32)
    tokens = jax.random.randint(k_tok, (batch, seq), 0, vocab_size, jnp.int32)

    out = token_embedding(tokens, emb_table)
    out = jax.block_until_ready(out)

    # Reference check (plain JAX gather).
    ref = jnp.take(emb_table, tokens, axis=0) * math.sqrt(emb_size)
    assert out.shape == (batch, seq, emb_size)
    assert jnp.allclose(out, ref, atol=1e-5, rtol=1e-5)

    print("KERNEL_OK")
</pallas_src>

<mosaic_0001>
module attributes {stable_mosaic.version = 11 : i64} {
  func.func @_token_embedding_kernel(%arg0: i32, %arg1: memref<16xi32, #tpu.memory_space<smem>>, %arg2: memref<32x32xf32, #tpu.memory_space<vmem>>, %arg3: memref<16x32xf32, #tpu.memory_space<vmem>>) attributes {dimension_semantics = [#tpu.dimension_semantics<parallel>], iteration_bounds = array<i64: 1>, scalar_prefetch = 1 : i64, scratch_operands = 0 : i64, tpu.core_type = #tpu.core_type<tc>, window_params = [{pipeline_mode = #tpu.pipeline_mode<synchronous>, transform_indices = @transform_0, window_bounds = array<i64: 32, 32>}, {transform_indices = @transform_1, window_bounds = array<i64: 16, 32>}]} {
    %c16_i32 = arith.constant 16 : i32
    %0 = arith.muli %arg0, %c16_i32 : i32
    %c0_i32 = arith.constant 0 : i32
    %c2_i32 = arith.constant 2 : i32
    %1 = arith.addi %c0_i32, %c2_i32 : i32
    %c1_i32 = arith.constant 1 : i32
    scf.for %arg4 = %c0_i32 to %1 step %c1_i32  : i32 {
      %c8_i32 = arith.constant 8 : i32
      %2 = arith.muli %arg4, %c8_i32 : i32
      %c0_i32_1 = arith.constant 0 : i32
      %3 = arith.addi %2, %c0_i32_1 : i32
      %4 = arith.addi %0, %3 : i32
      %5 = arith.index_cast %4 : i32 to index
      %6 = memref.load %arg1[%5] : memref<16xi32, #tpu.memory_space<smem>>
      %7 = arith.index_cast %6 : i32 to index
      %c0 = arith.constant 0 : index
      %8 = vector.load %arg2[%7, %c0] : memref<32x32xf32, #tpu.memory_space<vmem>>, vector<1x32xf32>
      %cst = arith.constant 5.65685415 : f32
      %9 = vector.broadcast %cst : f32 to vector<1x32xf32>
      %10 = arith.mulf %8, %9 : vector<1x32xf32>
      %11 = arith.index_cast %3 : i32 to index
      %c0_2 = arith.constant 0 : index
      %12 = vector.load %arg3[%11, %c0_2] : memref<16x32xf32, #tpu.memory_space<vmem>>, vector<1x32xf32>
      tpu.vector_store %arg3[%11, %c0_2], %10 {strides = array<i32>} : memref<16x32xf32, #tpu.memory_space<vmem>>, vector<1x32xf32>,
      %c1_i32_3 = arith.constant 1 : i32
      %13 = arith.addi %2, %c1_i32_3 : i32
      %14 = arith.addi %0, %13 : i32
      %15 = arith.index_cast %14 : i32 to index
      %16 = memref.load %arg1[%15] : memref<16xi32, #tpu.memory_space<smem>>
      %17 = arith.index_cast %16 : i32 to index
      %c0_4 = arith.constant 0 : index
      %18 = vector.load %arg2[%17, %c0_4] : memref<32x32xf32, #tpu.memory_space<vmem>>, vector<1x32xf32>
      %cst_5 = arith.constant 5.65685415 : f32
      %19 = vector.broadcast %cst_5 : f32 to vector<1x32xf32>
      %20 = arith.mulf %18, %19 : vector<1x32xf32>
      %21 = arith.index_cast %13 : i32 to index
      %c0_6 = arith.constant 0 : index
      %22 = vector.load %arg3[%21, %c0_6] : memref<16x32xf32, #tpu.memory_space<vmem>>, vector<1x32xf32>
      tpu.vector_store %arg3[%21, %c0_6], %20 {strides = array<i32>} : memref<16x32xf32, #tpu.memory_space<vmem>>, vector<1x32xf32>,
      %c2_i32_7 = arith.constant 2 : i32
      %23 = arith.addi %2, %c2_i32_7 : i32
      %24 = arith.addi %0, %23 : i32
      %25 = arith.index_cast %24 : i32 to index
      %26 = memref.load %arg1[%25] : memref<16xi32, #tpu.memory_space<smem>>
      %27 = arith.index_cast %26 : i32 to index
      %c0_8 = arith.constant 0 : index
      %28 = vector.load %arg2[%27, %c0_8] : memref<32x32xf32, #tpu.memory_space<vmem>>, vector<1x32xf32>
      %cst_9 = arith.constant 5.65685415 : f32
      %29 = vector.broadcast %cst_9 : f32 to vector<1x32xf32>
      %30 = arith.mulf %28, %29 : vector<1x32xf32>
      %31 = arith.index_cast %23 : i32 to index
      %c0_10 = arith.constant 0 : index
      %32 = vector.load %arg3[%31, %c0_10] : memref<16x32xf32, #tpu.memory_space<vmem>>, vector<1x32xf32>
      tpu.vector_store %arg3[%31, %c0_10], %30 {strides = array<i32>} : memref<16x32xf32, #tpu.memory_space<vmem>>, vector<1x32xf32>,
      %c3_i32 = arith.constant 3 : i32
      %33 = arith.addi %2, %c3_i32 : i32
      %34 = arith.addi %0, %33 : i32
      %35 = arith.index_cast %34 : i32 to index
      %36 = memref.load %arg1[%35] : memref<16xi32, #tpu.memory_space<smem>>
      %37 = arith.index_cast %36 : i32 to index
      %c0_11 = arith.constant 0 : index
      %38 = vector.load %arg2[%37, %c0_11] : memref<32x32xf32, #tpu.memory_space<vmem>>, vector<1x32xf32>
      %cst_12 = arith.constant 5.65685415 : f32
      %39 = vector.broadcast %cst_12 : f32 to vector<1x32xf32>
      %40 = arith.mulf %38, %39 : vector<1x32xf32>
      %41 = arith.index_cast %33 : i32 to index
      %c0_13 = arith.constant 0 : index
      %42 = vector.load %arg3[%41, %c0_13] : memref<16x32xf32, #tpu.memory_space<vmem>>, vector<1x32xf32>
      tpu.vector_store %arg3[%41, %c0_13], %40 {strides = array<i32>} : memref<16x32xf32, #tpu.memory_space<vmem>>, vector<1x32xf32>,
      %c4_i32 = arith.constant 4 : i32
      %43 = arith.addi %2, %c4_i32 : i32
      %44 = arith.addi %0, %43 : i32
      %45 = arith.index_cast %44 : i32 to index
      %46 = memref.load %arg1[%45] : memref<16xi32, #tpu.memory_space<smem>>
      %47 = arith.index_cast %46 : i32 to index
      %c0_14 = arith.constant 0 : index
      %48 = vector.load %arg2[%47, %c0_14] : memref<32x32xf32, #tpu.memory_space<vmem>>, vector<1x32xf32>
      %cst_15 = arith.constant 5.65685415 : f32
      %49 = vector.broadcast %cst_15 : f32 to vector<1x32xf32>
      %50 = arith.mulf %48, %49 : vector<1x32xf32>
      %51 = arith.index_cast %43 : i32 to index
      %c0_16 = arith.constant 0 : index
      %52 = vector.load %arg3[%51, %c0_16] : memref<16x32xf32, #tpu.memory_space<vmem>>, vector<1x32xf32>
      tpu.vector_store %arg3[%51, %c0_16], %50 {strides = array<i32>} : memref<16x32xf32, #tpu.memory_space<vmem>>, vector<1x32xf32>,
      %c5_i32 = arith.constant 5 : i32
      %53 = arith.addi %2, %c5_i32 : i32
      %54 = arith.addi %0, %53 : i32
      %55 = arith.index_cast %54 : i32 to index
      %56 = memref.load %arg1[%55] : memref<16xi32, #tpu.memory_space<smem>>
      %57 = arith.index_cast %56 : i32 to index
      %c0_17 = arith.constant 0 : index
      %58 = vector.load %arg2[%57, %c0_17] : memref<32x32xf32, #tpu.memory_space<vmem>>, vector<1x32xf32>
      %cst_18 = arith.constant 5.65685415 : f32
      %59 = vector.broadcast %cst_18 : f32 to vector<1x32xf32>
      %60 = arith.mulf %58, %59 : vector<1x32xf32>
      %61 = arith.index_cast %53 : i32 to index
      %c0_19 = arith.constant 0 : index
      %62 = vector.load %arg3[%61, %c0_19] : memref<16x32xf32, #tpu.memory_space<vmem>>, vector<1x32xf32>
      tpu.vector_store %arg3[%61, %c0_19], %60 {strides = array<i32>} : memref<16x32xf32, #tpu.memory_space<vmem>>, vector<1x32xf32>,
      %c6_i32 = arith.constant 6 : i32
      %63 = arith.addi %2, %c6_i32 : i32
      %64 = arith.addi %0, %63 : i32
      %65 = arith.index_cast %64 : i32 to index
      %66 = memref.load %arg1[%65] : memref<16xi32, #tpu.memory_space<smem>>
      %67 = arith.index_cast %66 : i32 to index
      %c0_20 = arith.constant 0 : index
      %68 = vector.load %arg2[%67, %c0_20] : memref<32x32xf32, #tpu.memory_space<vmem>>, vector<1x32xf32>
      %cst_21 = arith.constant 5.65685415 : f32
      %69 = vector.broadcast %cst_21 : f32 to vector<1x32xf32>
      %70 = arith.mulf %68, %69 : vector<1x32xf32>
      %71 = arith.index_cast %63 : i32 to index
      %c0_22 = arith.constant 0 : index
      %72 = vector.load %arg3[%71, %c0_22] : memref<16x32xf32, #tpu.memory_space<vmem>>, vector<1x32xf32>
      tpu.vector_store %arg3[%71, %c0_22], %70 {strides = array<i32>} : memref<16x32xf32, #tpu.memory_space<vmem>>, vector<1x32xf32>,
      %c7_i32 = arith.constant 7 : i32
      %73 = arith.addi %2, %c7_i32 : i32
      %74 = arith.addi %0, %73 : i32
      %75 = arith.index_cast %74 : i32 to index
      %76 = memref.load %arg1[%75] : memref<16xi32, #tpu.memory_space<smem>>
      %77 = arith.index_cast %76 : i32 to index
      %c0_23 = arith.constant 0 : index
      %78 = vector.load %arg2[%77, %c0_23] : memref<32x32xf32, #tpu.memory_space<vmem>>, vector<1x32xf32>
      %cst_24 = arith.constant 5.65685415 : f32
      %79 = vector.broadcast %cst_24 : f32 to vector<1x32xf32>
      %80 = arith.mulf %78, %79 : vector<1x32xf32>
      %81 = arith.index_cast %73 : i32 to index
      %c0_25 = arith.constant 0 : index
      %82 = vector.load %arg3[%81, %c0_25] : memref<16x32xf32, #tpu.memory_space<vmem>>, vector<1x32xf32>
      tpu.vector_store %arg3[%81, %c0_25], %80 {strides = array<i32>} : memref<16x32xf32, #tpu.memory_space<vmem>>, vector<1x32xf32>,
    }
    %c2_i32_0 = arith.constant 2 : i32
    return
  }
  func.func @transform_0(%arg0: i32, %arg1: memref<16xi32, #tpu.memory_space<smem>>) -> (i32, i32) {
    %c0_i32 = arith.constant 0 : i32
    %c0_i32_0 = arith.constant 0 : i32
    %c0_i32_1 = arith.constant 0 : i32
    return %c0_i32, %c0_i32_0 : i32, i32
  }
  func.func @transform_1(%arg0: i32, %arg1: memref<16xi32, #tpu.memory_space<smem>>) -> (i32, i32) {
    %c0_i32 = arith.constant 0 : i32
    %c0_i32_0 = arith.constant 0 : i32
    return %arg0, %c0_i32 : i32, i32
  }
}

</mosaic_0001>

<bundles_post_ra>
// kernel: tpu_custom_call.1
= control target key start
LH: loop header
LB: loop body
LE: loop exit
PB: predicated region body
PF: predicated region fallthrough
CT: control target
= control target key end

     0   :  { %s263_s12 = smov [#allocation3]   ;;  %s315_s0 = inlined_call_operand.hbm [shape: s32[16], index: 0, kind: input, shape index: {}]   ;;  %s316_s1 = inlined_call_operand.hbm [shape: f32[32,32], index: 1, kind: input, shape index: {}]   ;;  %s317_s2 = inlined_call_operand.hbm [shape: f32[16,32], index: 2, kind: output, shape index: {}]  }
   0x1   :  { %s8_s11 = sshll.u32 %s315_s0, 4  ;;  %s9_s11 = int_to_ptr.hbm [resolvable:$true] %s8_s11 }
   0x2   :  { %11 = dma.hbm_to_smem %s9_s11, 16, %s263_s12, [#allocation2] }
   0x3   :  { %253 = dma.done.wait [#allocation2], 16 }
   0x4   :  { %254 = vsyncadd [#allocation2], 4294967280 }
   0x5   :  { %14 = sfence }
   0x6   :  { %15 = vsyncpa [#allocation5], 0 }
   0x7   :  { %16 = vsyncpa [#allocation6], 0  ;;  %s21_s15 = sshll.u32 %s316_s1, 4  ;;  %s264_s16 = smov [#allocation4]   ;;  %s22_s15 = int_to_ptr.hbm [resolvable:$true] %s21_s15 }
   0x8   :  { %s23_s17 = sshll.u32 %s264_s16, 4  ;;  %s265_s18 = smov 128   ;;  %s24_s17 = int_to_ptr.vmem [resolvable:$true] %s23_s17 }
   0x9   :  { %s266_s19 = smov 8  }
   0xa   :  { %29 = dma.hbm_to_vmem [thread:$0]  %s22_s15, 512, %s24_s17, [#allocation5], %s265_s18, %s265_s18, %s266_s19  }
   0xb   :  { %255 = dma.done.wait [#allocation5], 512  }
   0xc   :  { %256 = vsyncadd [#allocation5], 4294966784  ;;  %s292_s0 = smov 0  }
   0xd LB: > { %s161_s1 = sshll.u32 %s261_s0, 3  ;;  %vm48_vm0 = vcmask 253952   ;;  %s40_s0 = sadd.s32 1, %s261_s0   ;;  %s261_s0 = sphi %s292_s0, %s40_s0  }
   0xe   : > { %s43_s20 = sld [smem:[#allocation3 + %s161_s1]]  ;;  %s50_s21 = sadd.s32 1, %s161_s1 }
   0xf   : > { %s58_s22 = sadd.s32 2, %s161_s1  ;;  %s52_s23 = sld [smem:[#allocation3 + %s50_s21]] }
  0x10   : > { %s66_s24 = sadd.s32 3, %s161_s1  ;;  %s60_s25 = sld [smem:[#allocation3 + %s58_s22]] }
  0x11   : > { %s74_s26 = sadd.s32 4, %s161_s1  ;;  %s68_s27 = sld [smem:[#allocation3 + %s66_s24]] }
  0x12   : > { %s82_s28 = sadd.s32 5, %s161_s1  ;;  %s76_s29 = sld [smem:[#allocation3 + %s74_s26]] }
  0x13   : > { %s90_s30 = sadd.s32 6, %s161_s1  ;;  %s84_s3 = sld [smem:[#allocation3 + %s82_s28]] }
  0x14   : > { %s44_s4 = scalar_lea.vmem [#allocation4], %s43_s20  ;;  %s92_s5 = sld [smem:[#allocation3 + %s90_s30]] }
  0x15   : > { %v45_v0 = vld [vmem:[%s44_s4] sm:$0x1]  ;;  %s98_s6 = sadd.s32 7, %s161_s1  ;;  %s53_s7 = scalar_lea.vmem [#allocation4], %s52_s23 }
  0x16   : > { %v46_v1 = vmul.f32 5.656854, %v45_v0  ;;  %v54_v2 = vld [vmem:[%s53_s7] sm:$0x1]  ;;  %s100_s8 = sld [smem:[#allocation3 + %s98_s6]]  ;;  %s47_s9 = scalar_lea.vmem [#allocation7], %s161_s1 }
  0x17   : > { %v55_v3 = vmul.f32 5.656854, %v54_v2  ;;  %s61_s10 = scalar_lea.vmem [#allocation4], %s60_s25  ;;  %s69_s11 = scalar_lea.vmem [#allocation4], %s68_s27 }
  0x18   : > { %49 = vst.msk [vmem:[%s47_s9] sm:$0x1] %vm48_vm0, %v46_v1  ;;  %v62_v4 = vld [vmem:[%s61_s10] sm:$0x1]  ;;  %s77_s12 = scalar_lea.vmem [#allocation4], %s76_s29  ;;  %p37_p0 = scmp.ge.s32.totalorder %s40_s0, 2  }
  0x19   : > { %v63_v5 = vmul.f32 5.656854, %v62_v4  ;;  %163 = vst.msk [vmem:[%s47_s9 + $0x1] sm:$0x1] %vm48_vm0, %v55_v3  ;;  %v70_v6 = vld [vmem:[%s69_s11] sm:$0x1] }
  0x1a   : > { %v78_v7 = vld [vmem:[%s77_s12] sm:$0x1]  ;;  %v71_v8 = vmul.f32 5.656854, %v70_v6  ;;  %s85_s13 = scalar_lea.vmem [#allocation4], %s84_s3  ;;  %s93_s14 = scalar_lea.vmem [#allocation4], %s92_s5 }
  0x1b   : > { %165 = vst.msk [vmem:[%s47_s9 + $0x2] sm:$0x1] %vm48_vm0, %v63_v5  ;;  %v79_v9 = vmul.f32 5.656854, %v78_v7  ;;  %v86_v10 = vld [vmem:[%s85_s13] sm:$0x1] }
  0x1c   : > { %167 = vst.msk [vmem:[%s47_s9 + $0x3] sm:$0x1] %vm48_vm0, %v71_v8  ;;  %v94_v11 = vld [vmem:[%s93_s14] sm:$0x1]  ;;  %v87_v12 = vmul.f32 5.656854, %v86_v10 }
  0x1d   : > { %169 = vst.msk [vmem:[%s47_s9 + $0x4] sm:$0x1] %vm48_vm0, %v79_v9  ;;  %v95_v13 = vmul.f32 5.656854, %v94_v11  ;;  %s101_s15 = scalar_lea.vmem [#allocation4], %s100_s8  ;;  %39 = sbr.rel (!%p37_p0) target bundleno = 13 (0xd), region = 51 }
  0x1e   : > { %171 = vst.msk [vmem:[%s47_s9 + $0x5] sm:$0x1] %vm48_vm0, %v87_v12  ;;  %v102_v14 = vld [vmem:[%s101_s15] sm:$0x1]  ;;  %s112_s1 = sshll.u32 (%p37_p0), %s317_s2, 4  ;;  %s267_s20 = smov (%p37_p0), [#allocation7]   ;;  %s113_s1 = int_to_ptr.hbm [resolvable:$true] %s112_s1 }
  0x1f   : > { %173 = vst.msk [vmem:[%s47_s9 + $0x6] sm:$0x1] %vm48_vm0, %v95_v13  ;;  %v103_v15 = vmul.f32 5.656854, %v102_v14  ;;  %s110_s21 = sshll.u32 (%p37_p0), %s267_s20, 4  ;;  %s111_s21 = int_to_ptr.vmem [resolvable:$true] %s110_s21 }
  0x21   : > { %175 = vst.msk [vmem:[%s47_s9 + $0x7] sm:$0x1] %vm48_vm0, %v103_v15 }
  0x22   :  { %118 = dma.vmem_to_hbm [thread:$0]  %s111_s21, 256, %s113_s1, [#allocation6], %s265_s18, %s265_s18, %s266_s19  }
  0x23   :  { %257 = dma.done.wait [#allocation6], 256  }
  0x24   :  { %258 = vsyncadd [#allocation6], 4294967040 }
  0x25   :  { %123 = vsyncpa [#allocation5], 1 }
  0x26   :  { %124 = vsyncpa [#allocation6], 1 }

</bundles_post_ra>
